<compile_context>
chip_gen: v7x
topology: tpu7x:2x2x1
jax: 0.10.0
libtpu: 0.0.40
codegen_flags: <defaults>
</compile_context>

<pallas_src>
import jax
import jax.numpy as jnp
from jax.experimental import pallas as pl
from jax.experimental.pallas import tpu as pltpu


def _round_up(x: int, m: int) -> int:
    return ((x + m - 1) // m) * m


# --------------------------------------------------------------------------- #
# One-time parameter preparation (hoisted out of the forward path).
# --------------------------------------------------------------------------- #
def prepare_params(params):
    """Pad to lane tiles and fuse the two heads into one [Hp, 2*Gp] matmul. Run once."""
    w1, b1, w2, b2, w3, b3 = (params[k] for k in ("w1", "b1", "w2", "b2", "w3", "b3"))
    D_in, H = w1.shape
    G = w2.shape[1]
    Hp = _round_up(H, 128)
    Gp = _round_up(G, 128)
    f32, bf16 = jnp.float32, jnp.bfloat16

    w1p = jnp.zeros((D_in, Hp), bf16).at[:, :H].set(w1.astype(bf16))
    b1p = jnp.zeros((1, Hp), f32).at[:, :H].set(b1.reshape(1, -1).astype(f32))
    w23p = (jnp.zeros((Hp, 2 * Gp), bf16)
            .at[:H, :G].set(w2.astype(bf16))
            .at[:H, Gp:Gp + G].set(w3.astype(bf16)))
    b23p = (jnp.zeros((1, 2 * Gp), f32)
            .at[:, :G].set(b2.reshape(1, -1).astype(f32))
            .at[:, Gp:Gp + G].set(b3.reshape(1, -1).astype(f32)))
    return {"w1p": w1p, "b1p": b1p, "w23p": w23p, "b23p": b23p,
            "output_dim": G, "hidden_padded": Hp, "gene_padded": Gp}


# --------------------------------------------------------------------------- #
# Kernels
# --------------------------------------------------------------------------- #
def _make_resident_kernel(Gp):
    """1-D grid over batch tiles; full fused head resident in VMEM."""
    def kernel(x_ref, w1_ref, b1_ref, w23_ref, b23_ref, out_ref):
        h = jnp.dot(x_ref[...].astype(jnp.bfloat16), w1_ref[...],
                    preferred_element_type=jnp.float32)
        h = jnp.maximum(h + b1_ref[...], 0.0)
        z = jnp.dot(h.astype(jnp.bfloat16), w23_ref[...],
                    preferred_element_type=jnp.float32) + b23_ref[...]
        # Static, lane-aligned split of the fused output: [pred | gene_param].
        out_ref[:, :Gp] = jax.nn.softplus(z[:, :Gp]).astype(out_ref.dtype)
        out_ref[:, Gp:] = z[:, Gp:].astype(out_ref.dtype)
    return kernel


def _make_column_kernel(Gp, TN):
    """2-D grid (batch tiles x fused-head column tiles) for heads too big for VMEM."""
    def kernel(x_ref, w1_ref, b1_ref, w23_ref, b23_ref, out_ref, h_ref):
        j = pl.program_id(1)

        @pl.when(j == 0)
        def _():
            h = jnp.dot(x_ref[...].astype(jnp.bfloat16), w1_ref[...],
                        preferred_element_type=jnp.float32)
            h_ref[...] = jnp.maximum(h + b1_ref[...], 0.0).astype(jnp.bfloat16)

        z = jnp.dot(h_ref[...], w23_ref[...],
                    preferred_element_type=jnp.float32) + b23_ref[...]

        # TN divides Gp, so each column tile lies entirely inside one head.
        is_pred = (j + 1) * TN <= Gp

        @pl.when(is_pred)
        def _():
            out_ref[...] = jax.nn.softplus(z).astype(out_ref.dtype)

        @pl.when(jnp.logical_not(is_pred))
        def _():
            out_ref[...] = z.astype(out_ref.dtype)
    return kernel


# --------------------------------------------------------------------------- #
# Tiling plan / VMEM budget
# --------------------------------------------------------------------------- #
def _vmem_budget_bytes():
    cap = 64 << 20                      # conservative fallback (v7x per-core VMEM)
    try:
        cap = int(pltpu.get_tpu_info().vmem_capacity_bytes)
    except Exception:
        pass
    return max(32 << 20, int(cap * 0.8))


def _plan_tiles(B, D_in, Hp, Gp, x_itemsize, out_itemsize, budget):
    two_g = 2 * Gp
    resident_w = D_in * Hp * 2 + Hp * 4            # w1 (bf16) + b1 (f32), single copy
    head_w = Hp * two_g * 2 + two_g * 4            # fused head (bf16) + bias, single copy

    bp8 = _round_up(B, 8)
    # Keep >= 2 batch tiles when the batch allows it (v7x megacore sharding).
    tb_cap = _round_up((B + 1) // 2, 8) if B >= 16 else bp8
    tb_cands = [t for t in (1024, 512, 256, 128, 64, 32, 16, 8) if t <= tb_cap] or [bp8]

    def cost_res(tb):
        return (resident_w + head_w
                + 2 * tb * D_in * x_itemsize        # x: double-buffered tiles
                + 2 * tb * two_g * out_itemsize)    # out: double-buffered tiles

    def cost_col(tb, tn):
        return (resident_w
                + tb * Hp * 2                       # h scratch (bf16)
                + 2 * tb * D_in * x_itemsize
                + 2 * (Hp * tn * 2 + tn * 4)        # streamed head column slabs
                + 2 * tb * tn * out_itemsize)

    for tb in tb_cands:                             # prefer resident head: head read once
        if cost_res(tb) <= budget:
            return "resident", tb, two_g
    tn_cands = [t for t in (4096, 2048, 1024, 512, 256, 128) if t <= Gp and Gp % t == 0]
    for tb in tb_cands:
        for tn in tn_cands:
            if cost_col(tb, tn) <= budget:
                return "column", tb, tn
    return "column", tb_cands[-1], tn_cands[-1]


# --------------------------------------------------------------------------- #
# Forward
# --------------------------------------------------------------------------- #
def distribution_supervised_forward(x, prepared, *, out_dtype=jnp.float32,
                                    _force_plan=None):
    """Fused gene-predictor forward. x: [B, D_in]; prepared = prepare_params(params)."""
    w1p, b1p = prepared["w1p"], prepared["b1p"]
    w23p, b23p = prepared["w23p"], prepared["b23p"]
    G, Gp = prepared["output_dim"], prepared["gene_padded"]
    B, D_in = x.shape
    assert w1p.shape[0] == D_in, "input dim mismatch with prepared params"
    Hp = w1p.shape[1]
    two_g = 2 * Gp

    out_itemsize = jnp.dtype(out_dtype).itemsize
    budget = _vmem_budget_bytes()
    mode, TB, TN = (_force_plan if _force_plan is not None else
                    _plan_tiles(B, D_in, Hp, Gp, x.dtype.itemsize, out_itemsize, budget))

    # Batch padding only if needed (no lane padding / no copy in the common case).
    Bp = _round_up(B, TB)
    x_in = x if Bp == B else jnp.zeros((Bp, D_in), x.dtype).at[:B].set(x)
    nb = Bp // TB

    resident = pl.BlockSpec(memory_space=pltpu.MemorySpace.VMEM)  # whole array, 1x in VMEM

    if mode == "resident":
        grid = (nb,)
        in_specs = [
            pl.BlockSpec((TB, D_in), lambda i: (i, 0)),   # x streamed per batch tile
            resident, resident, resident, resident,        # weights resident (single copy)
        ]
        out_specs = pl.BlockSpec((TB, two_g), lambda i: (i, 0))
        scratch_shapes = ()
        kernel = _make_resident_kernel(Gp)
        dims = ("parallel",)
        head_reads = w23p.size * 2 + b23p.size * 4
    else:
        nc = two_g // TN
        grid = (nb, nc)
        in_specs = [
            pl.BlockSpec((TB, D_in), lambda i, j: (i, 0)),
            resident, resident,                            # w1 / b1 resident
            pl.BlockSpec((Hp, TN), lambda i, j: (0, j)),   # fused-head column slabs
            pl.BlockSpec((1, TN), lambda i, j: (0, j)),
        ]
        out_specs = pl.BlockSpec((TB, TN), lambda i, j: (i, j))
        scratch_shapes = (pltpu.VMEM((TB, Hp), jnp.bfloat16),)
        kernel = _make_column_kernel(Gp, TN)
        dims = ("parallel", "arbitrary")
        head_reads = nb * (w23p.size * 2 + b23p.size * 4)

    cost = pl.CostEstimate(
        flops=2 * Bp * D_in * Hp + 2 * Bp * Hp * two_g,
        transcendentals=2 * Bp * Gp,                       # softplus ~ exp + log1p
        bytes_accessed=(x_in.size * x_in.dtype.itemsize
                        + w1p.size * 2 + b1p.size * 4 + head_reads
                        + Bp * two_g * out_itemsize),
    )

    fused = pl.pallas_call(
        kernel,
        out_shape=jax.ShapeDtypeStruct((Bp, two_g), out_dtype),
        grid=grid,
        in_specs=in_specs,
        out_specs=out_specs,
        scratch_shapes=scratch_shapes,
        compiler_params=pltpu.CompilerParams(
            dimension_semantics=dims,
            vmem_limit_bytes=int(budget),
        ),
        cost_estimate=cost,
    )(x_in, w1p, b1p, w23p, b23p)

    # Mirror the module's dict interface (slice padding back off).
    return {
        "output_embedding": x,                          # REGISTRY_KEYS.OUTPUT_EMBEDDING = X
        "output_prediction": fused[:B, :G],             # REGISTRY_KEYS.OUTPUT_PREDICTION
        "output_gene_param": fused[:B, Gp:Gp + G],      # REGISTRY_KEYS.OUTPUT_GENE_PARAM
    }


def init_params(key, d_in, hidden, output_dim):
    k1, k2, k3 = jax.random.split(key, 3)
    s1 = 1.0 / jnp.sqrt(d_in)
    s2 = 1.0 / jnp.sqrt(hidden)
    return {
        "w1": jax.random.normal(k1, (d_in, hidden), jnp.float32) * s1,
        "b1": jnp.zeros((1, hidden), jnp.float32),
        "w2": jax.random.normal(k2, (hidden, output_dim), jnp.float32) * s2,
        "b2": jnp.zeros((1, output_dim), jnp.float32),
        "w3": jax.random.normal(k3, (hidden, output_dim), jnp.float32) * s2,
        "b3": jnp.zeros((1, output_dim), jnp.float32),
    }


if __name__ == "__main__":
    key = jax.random.PRNGKey(0)
    kx, kp = jax.random.split(key)

    B, D_in, H, G = 8, 32, 64, 16          # batch, embedding dim, hidden, genes
    x = jax.random.normal(kx, (B, D_in), jnp.float32)
    params = init_params(kp, D_in, H, G)

    prepared = prepare_params(params)       # one-time pad + head fusion (hoisted)

    # Default path (resident fused head).
    out = distribution_supervised_forward(x, prepared)
    jax.block_until_ready(out)

    # Also exercise the column-streaming path used for large gene counts.
    out_col = distribution_supervised_forward(x, prepared,
                                              _force_plan=("column", 8, 128))
    jax.block_until_ready(out_col)

    # Pure-JAX reference with the same bf16 quantization as the kernel.
    q = lambda a: a.astype(jnp.bfloat16).astype(jnp.float32)
    h_ref = jnp.maximum(q(x) @ q(params["w1"]) + params["b1"], 0.0)
    hq = q(h_ref)
    pred_ref = jax.nn.softplus(hq @ q(params["w2"]) + params["b2"])
    gp_ref = hq @ q(params["w3"]) + params["b3"]

    for o in (out, out_col):
        assert o["output_prediction"].shape == (B, G)
        assert o["output_gene_param"].shape == (B, G)
        assert jnp.allclose(o["output_embedding"], x)
        assert jnp.allclose(o["output_prediction"], pred_ref, atol=1e-2, rtol=1e-2)
        assert jnp.allclose(o["output_gene_param"], gp_ref, atol=1e-2, rtol=1e-2)

    print("KERNEL_OK")
</pallas_src>

<mosaic_0001>
module attributes {stable_mosaic.version = 11 : i64} {
  func.func @kernel(%arg0: i32, %arg1: memref<8x32xf32, #tpu.memory_space<vmem>>, %arg2: memref<32x128xbf16, #tpu.memory_space<vmem>>, %arg3: memref<1x128xf32, #tpu.memory_space<vmem>>, %arg4: memref<128x256xbf16, #tpu.memory_space<vmem>>, %arg5: memref<1x256xf32, #tpu.memory_space<vmem>>, %arg6: memref<8x256xf32, #tpu.memory_space<vmem>>) attributes {dimension_semantics = [#tpu.dimension_semantics<parallel>], iteration_bounds = array<i64: 1>, scalar_prefetch = 0 : i64, scratch_operands = 0 : i64, tpu.core_type = #tpu.core_type<tc>, window_params = [{transform_indices = @transform_0, window_bounds = array<i64: 8, 32>}, {pipeline_mode = #tpu.pipeline_mode<synchronous>, transform_indices = @transform_1, window_bounds = array<i64: 32, 128>}, {pipeline_mode = #tpu.pipeline_mode<synchronous>, transform_indices = @transform_2, window_bounds = array<i64: 1, 128>}, {pipeline_mode = #tpu.pipeline_mode<synchronous>, transform_indices = @transform_3, window_bounds = array<i64: 128, 256>}, {pipeline_mode = #tpu.pipeline_mode<synchronous>, transform_indices = @transform_4, window_bounds = array<i64: 1, 256>}, {transform_indices = @transform_5, window_bounds = array<i64: 8, 256>}]} {
    %c0 = arith.constant 0 : index
    %c0_0 = arith.constant 0 : index
    %0 = vector.load %arg1[%c0, %c0_0] : memref<8x32xf32, #tpu.memory_space<vmem>>, vector<8x32xf32>
    %1 = arith.truncf %0 : vector<8x32xf32> to vector<8x32xbf16>
    %c0_1 = arith.constant 0 : index
    %c0_2 = arith.constant 0 : index
    %2 = vector.load %arg2[%c0_1, %c0_2] : memref<32x128xbf16, #tpu.memory_space<vmem>>, vector<32x128xbf16>
    %cst = arith.constant dense<0.000000e+00> : vector<8x128xf32>
    %3 = tpu.matmul %1, %2, %cst {dimension_numbers = #tpu.dot_dimension_numbers<[1], [0], [0], [1], [0, 0, 1, 1], [], []>} : vector<8x32xbf16>, vector<32x128xbf16>, vector<8x128xf32> -> vector<8x128xf32>
    %c0_3 = arith.constant 0 : index
    %c0_4 = arith.constant 0 : index
    %4 = vector.load %arg3[%c0_3, %c0_4] : memref<1x128xf32, #tpu.memory_space<vmem>>, vector<1x128xf32>
    %5 = vector.broadcast %4 : vector<1x128xf32> to vector<8x128xf32>
    %6 = arith.addf %3, %5 : vector<8x128xf32>
    %cst_5 = arith.constant 0.000000e+00 : f32
    %7 = vector.broadcast %cst_5 : f32 to vector<8x128xf32>
    %8 = arith.maximumf %6, %7 : vector<8x128xf32>
    %9 = arith.truncf %8 : vector<8x128xf32> to vector<8x128xbf16>
    %c0_6 = arith.constant 0 : index
    %c0_7 = arith.constant 0 : index
    %10 = vector.load %arg4[%c0_6, %c0_7] : memref<128x256xbf16, #tpu.memory_space<vmem>>, vector<128x256xbf16>
    %cst_8 = arith.constant dense<0.000000e+00> : vector<8x256xf32>
    %11 = tpu.matmul %9, %10, %cst_8 {dimension_numbers = #tpu.dot_dimension_numbers<[1], [0], [0], [1], [0, 0, 1, 1], [], []>} : vector<8x128xbf16>, vector<128x256xbf16>, vector<8x256xf32> -> vector<8x256xf32>
    %c0_9 = arith.constant 0 : index
    %c0_10 = arith.constant 0 : index
    %12 = vector.load %arg5[%c0_9, %c0_10] : memref<1x256xf32, #tpu.memory_space<vmem>>, vector<1x256xf32>
    %13 = vector.broadcast %12 : vector<1x256xf32> to vector<8x256xf32>
    %14 = arith.addf %11, %13 : vector<8x256xf32>
    %15 = vector.extract_strided_slice %14 {offsets = [0, 0], sizes = [8, 128], strides = [1, 1]} : vector<8x256xf32> to vector<8x128xf32>
    %cst_11 = arith.constant 0.000000e+00 : f32
    %16 = vector.broadcast %cst_11 : f32 to vector<8x128xf32>
    %17 = arith.maximumf %15, %16 : vector<8x128xf32>
    %18 = vector.broadcast %cst_11 : f32 to vector<8x128xf32>
    %19 = arith.subf %15, %18 : vector<8x128xf32>
    %20 = arith.cmpf one, %19, %19 : vector<8x128xf32>
    %21 = vector.broadcast %cst_11 : f32 to vector<8x128xf32>
    %22 = arith.addf %15, %21 : vector<8x128xf32>
    %23 = math.absf %19 : vector<8x128xf32>
    %cst_12 = arith.constant 0.000000e+00 : f32
    %24 = vector.broadcast %cst_12 : f32 to vector<8x128xf32>
    %25 = arith.subf %24, %23 : vector<8x128xf32>
    %26 = math.exp %25 : vector<8x128xf32>
    %27 = math.log1p %26 : vector<8x128xf32>
    %28 = arith.addf %17, %27 : vector<8x128xf32>
    %29 = arith.select %20, %22, %28 : vector<8x128xi1>, vector<8x128xf32>
    %c0_13 = arith.constant 0 : index
    %c0_14 = arith.constant 0 : index
    %30 = vector.load %arg6[%c0_13, %c0_14] : memref<8x256xf32, #tpu.memory_space<vmem>>, vector<8x128xf32>
    tpu.vector_store %arg6[%c0_13, %c0_14], %29 {strides = array<i32>} : memref<8x256xf32, #tpu.memory_space<vmem>>, vector<8x128xf32>,
    %31 = vector.extract_strided_slice %14 {offsets = [0, 128], sizes = [8, 128], strides = [1, 1]} : vector<8x256xf32> to vector<8x128xf32>
    %c0_15 = arith.constant 0 : index
    %c128 = arith.constant 128 : index
    %32 = vector.load %arg6[%c0_15, %c128] : memref<8x256xf32, #tpu.memory_space<vmem>>, vector<8x128xf32>
    tpu.vector_store %arg6[%c0_15, %c128], %31 {strides = array<i32>} : memref<8x256xf32, #tpu.memory_space<vmem>>, vector<8x128xf32>,
    return
  }
  func.func @transform_0(%arg0: i32) -> (i32, i32) {
    %c0_i32 = arith.constant 0 : i32
    %c0_i32_0 = arith.constant 0 : i32
    return %arg0, %c0_i32 : i32, i32
  }
  func.func @transform_1(%arg0: i32) -> (i32, i32) {
    %c0_i32 = arith.constant 0 : i32
    %c0_i32_0 = arith.constant 0 : i32
    %c0_i32_1 = arith.constant 0 : i32
    return %c0_i32, %c0_i32_0 : i32, i32
  }
  func.func @transform_2(%arg0: i32) -> (i32, i32) {
    %c0_i32 = arith.constant 0 : i32
    %c0_i32_0 = arith.constant 0 : i32
    %c0_i32_1 = arith.constant 0 : i32
    return %c0_i32, %c0_i32_0 : i32, i32
  }
  func.func @transform_3(%arg0: i32) -> (i32, i32) {
    %c0_i32 = arith.constant 0 : i32
    %c0_i32_0 = arith.constant 0 : i32
    %c0_i32_1 = arith.constant 0 : i32
    return %c0_i32, %c0_i32_0 : i32, i32
  }
  func.func @transform_4(%arg0: i32) -> (i32, i32) {
    %c0_i32 = arith.constant 0 : i32
    %c0_i32_0 = arith.constant 0 : i32
    %c0_i32_1 = arith.constant 0 : i32
    return %c0_i32, %c0_i32_0 : i32, i32
  }
  func.func @transform_5(%arg0: i32) -> (i32, i32) {
    %c0_i32 = arith.constant 0 : i32
    %c0_i32_0 = arith.constant 0 : i32
    return %arg0, %c0_i32 : i32, i32
  }
}

</mosaic_0001>

<bundles_post_ra>
// kernel: tpu_custom_call.1
= control target key start
LH: loop header
LB: loop body
LE: loop exit
PB: predicated region body
PF: predicated region fallthrough
CT: control target
= control target key end

     0   :  { %10 = vsyncpa [#allocation3], 0  ;;  %s578_s0 = inlined_call_operand.hbm [shape: f32[8,32], index: 0, kind: input, shape index: {}]   ;;  %s579_s1 = inlined_call_operand.hbm [shape: bf16[32,128], index: 1, kind: input, shape index: {}]   ;;  %s580_s2 = inlined_call_operand.vmem [shape: f32[1,128], index: 2, kind: input, shape index: {}]   ;;  %s581_s3 = inlined_call_operand.hbm [shape: bf16[128,256], index: 3, kind: input, shape index: {}]   ;;  %s582_s4 = inlined_call_operand.vmem [shape: f32[1,256], index: 4, kind: input, shape index: {}]   ;;  %s583_s5 = inlined_call_operand.hbm [shape: f32[8,256], index: 5, kind: output, shape index: {}]  }
   0x1   :  { %11 = vsyncpa [#allocation6], 0 }
   0x2   :  { %12 = vsyncpa [#allocation4], 0  ;;  %s483_s18 = smov [#allocation5]   ;;  %s389_s22 = scalar_lea.hbm %s579_s1, 256 }
   0x3   :  { %s28_s19 = sshll.u32 %s483_s18, 4  ;;  %p390_p0 = scmp.ne.s32.totalorder %s579_s1, %s389_s22  ;;  %s29_s19 = int_to_ptr.vmem [resolvable:$true] %s28_s19 }
   0x4   :  { %p393_p1 = scmp.lt.u32.totalorder %s389_s22, %s579_s1 }
   0x6   :  { %p395_p2 = pnand %p393_p1, %p390_p0 }
   0x8   :  { %398 = shalt.err (!%p395_p2)
}
   0x9   :  { %s399_s27 = scalar_lea.vmem %s29_s19, 256  ;;  %p404_p4 = scmp.lt.s32.totalorder %s29_s19, %s29_s19 }
   0xa   :  { %p400_p3 = scmp.ne.s32.totalorder %s29_s19, %s399_s27  ;;  %p405_p5 = scmp.lt.s32.totalorder %s399_s27, %s399_s27 }
   0xc   :  { %p406_p6 = por %p405_p5, %p404_p4 }
   0xe   :  { %p407_p7 = pnand %p406_p6, %p400_p3 }
  0x10   :  { %410 = shalt.err (!%p407_p7)
}
  0x11   :  { %s484_s28 = smov 64   ;;  %s485_s29 = smov 4  }
  0x12   :  { %34 = dma.hbm_to_vmem [thread:$0]  %s579_s1, 256, %s29_s19, [#allocation6], %s484_s28, %s484_s28, %s485_s29  }
  0x13   :  { %s486_s7 = smov [#allocation2]   ;;  %s487_s9 = smov [#allocation7]  }
  0x14   :  { %s19_s8 = sshll.u32 %s486_s7, 4  ;;  %s42_s10 = sshll.u32 %s487_s9, 4  ;;  %s20_s8 = int_to_ptr.vmem [resolvable:$true] %s19_s8  ;;  %s43_s10 = int_to_ptr.vmem [resolvable:$true] %s42_s10 }
  0x15   :  { %s411_s13 = scalar_lea.hbm %s578_s0, 128 }
  0x16   :  { %p412_p8 = scmp.ne.s32.totalorder %s578_s0, %s411_s13  ;;  %p415_p9 = scmp.lt.u32.totalorder %s411_s13, %s578_s0 }
  0x18   :  { %p417_p10 = pnand %p415_p9, %p412_p8 }
  0x1a   :  { %420 = shalt.err (!%p417_p10)
}
  0x1b   :  { %s421_s1 = scalar_lea.vmem %s20_s8, 128  ;;  %p426_p12 = scmp.lt.s32.totalorder %s20_s8, %s20_s8 }
  0x1c   :  { %p422_p11 = scmp.ne.s32.totalorder %s20_s8, %s421_s1  ;;  %p427_p13 = scmp.lt.s32.totalorder %s421_s1, %s421_s1 }
  0x1e   :  { %p428_p0 = por %p427_p13, %p426_p12 }
  0x20   :  { %p429_p1 = pnand %p428_p0, %p422_p11 }
  0x22   :  { %432 = shalt.err (!%p429_p1)
}
  0x23   :  { %22 = dma.hbm_to_vmem [thread:$0]  %s578_s0, 128, %s20_s8, [#allocation3]  }
  0x24   :  { %s433_s22 = scalar_lea.hbm %s581_s3, 2048 }
  0x25   :  { %p434_p2 = scmp.ne.s32.totalorder %s581_s3, %s433_s22  ;;  %p437_p3 = scmp.lt.u32.totalorder %s433_s22, %s581_s3 }
  0x27   :  { %p439_p4 = pnand %p437_p3, %p434_p2 }
  0x29   :  { %442 = shalt.err (!%p439_p4)
}
  0x2a   :  { %s443_s27 = scalar_lea.vmem %s43_s10, 2048  ;;  %p448_p6 = scmp.lt.s32.totalorder %s43_s10, %s43_s10 }
  0x2b   :  { %p444_p5 = scmp.ne.s32.totalorder %s43_s10, %s443_s27  ;;  %p449_p7 = scmp.lt.s32.totalorder %s443_s27, %s443_s27 }
  0x2d   :  { %p450_p8 = por %p449_p7, %p448_p6 }
  0x2f   :  { %p451_p9 = pnand %p450_p8, %p444_p5 }
  0x31   :  { %454 = shalt.err (!%p451_p9)
}
  0x32   :  { %s488_s0 = smov 128   ;;  %s489_s28 = smov 8  }
  0x33   :  { %48 = dma.hbm_to_vmem [thread:$0]  %s581_s3, 2048, %s43_s10, [#allocation6], %s488_s0, %s488_s0, %s489_s28  }
  0x34   :  { %477 = dma.done.wait [#allocation3], 128  }
  0x35   :  { %478 = vsyncadd [#allocation3], 4294967168 }
  0x36   :  { %479 = dma.done.wait [#allocation6], 2304  }
  0x37   :  { %480 = vsyncadd [#allocation6], 4294964992  ;;  %v490_v0 = vmov 0.0   ;;  %vm491_vm0 = vmmov 0   ;;  %v359_v1 = vld [vmem:[#allocation5] sm:$0xff]   ;;  %v360_v2 = vld [vmem:[#allocation5 + $0x8] sm:$0xff]   ;;  %v150_v30 = vlaneseq }
  0x38   :  { %340 = vmatprep.subr.bf16.mxu0 %v490_v0  ;;  %344 = vmatprep.mubr.msk.bf16.mxu0 %vm491_vm0, %v490_v0  ;;  %v61_v3 = vld [vmem:[#allocation2] sm:$0xff]  ;;  %v364_v6 = vld [vmem:[#allocation7 + $0x14] ss:$8 sps:$4 sm:$0xff]   ;;  %vm86_vm1 = vcmask 261120   ;;  %v366_v8 = vld [vmem:[#allocation7 + $0x10] ss:$8 sps:$4 sm:$0xff]  }
  0x39   :  { %341 = vmatpush3.bf16.msra.mxu0 %v359_v1  ;;  %v361_v4 = vld [vmem:[#allocation7 + $0x4] ss:$8 sps:$4 sm:$0xff]   ;;  %v363_v5 = vld [vmem:[#allocation7] ss:$8 sps:$4 sm:$0xff]   ;;  %v62_v7 = vpack.c.bf16 %v61_v3, %v61_v3  ;;  %v370_v11 = vld [vmem:[#allocation7 + $0x34] ss:$8 sps:$4 sm:$0xff]  }
  0x3a   :  { %342 = vmatprep.subr.bf16.mxu0 %v490_v0  ;;  %240 = vmatprep.subr.bf16.mxu1 %v361_v4  ;;  %v367_v9 = vld [vmem:[#allocation7 + $0x24] ss:$8 sps:$4 sm:$0xff]   ;;  %v369_v10 = vld [vmem:[#allocation7 + $0x20] ss:$8 sps:$4 sm:$0xff]   ;;  %v372_v12 = vld [vmem:[#allocation7 + $0x30] ss:$8 sps:$4 sm:$0xff]  }
  0x3b   :  { %241 = vmatpush1.bf16.msra.mxu1 %v363_v5  ;;  %v373_v13 = vld [vmem:[#allocation7 + $0x44] ss:$8 sps:$4 sm:$0xff]   ;;  %v375_v14 = vld [vmem:[#allocation7 + $0x40] ss:$8 sps:$4 sm:$0xff]   ;;  %v376_v15 = vld [vmem:[#allocation7 + $0x54] ss:$8 sps:$4 sm:$0xff]  }
  0x3c   :  { %242 = vmatprep.subr.bf16.mxu1 %v364_v6  ;;  %v378_v16 = vld [vmem:[#allocation7 + $0x50] ss:$8 sps:$4 sm:$0xff]   ;;  %v379_v17 = vld [vmem:[#allocation7 + $0x64] ss:$8 sps:$4 sm:$0xff]   ;;  %v381_v18 = vld [vmem:[#allocation7 + $0x60] ss:$8 sps:$4 sm:$0xff]  }
  0x3d   :  { %343 = vmatpush3.bf16.msra.mxu0 %v360_v2  ;;  %v382_v19 = vld [vmem:[#allocation7 + $0x74] ss:$8 sps:$4 sm:$0xff]   ;;  %v384_v20 = vld [vmem:[#allocation7 + $0x70] ss:$8 sps:$4 sm:$0xff]   ;;  %v492_v21 = vmov 0   ;;  %v151_v31 = vshrl.u32 %v150_v30, 7 }
  0x3e   :  { %272 = vmatprep.mubr.bf16.mxu1 %v492_v21  ;;  %v317_v22 = vld [vmem:[%s580_s2] ss:$0 sm:$0xff]  ;;  %s493_s2 = smov [#allocation8]  }
  0x3f   :  { %243 = vmatpush1.bf16.msra.mxu1 %v366_v8  ;;  %v152_v32 = vsub.s32 0, %v151_v31  ;;  %v148_v33 = vld [vmem:[%s582_s4] sm:$0x3]  ;;  %v156_v34 = vsub.s32 1, %v151_v31  ;;  %s307_s4 = sshll.u32 %s493_s2, 4  ;;  %s308_s4 = int_to_ptr.vmem [resolvable:$true] %s307_s4 }
  0x40   :  { %345 = vmatmul.mubr.msk.bf16.vlgmr.msra.gmra.mrb[0].mxu0 %vm86_vm1, %v62_v7  ;;  %244 = vmatprep.subr.bf16.mxu1 %v367_v9  ;;  %s455_s9 = scalar_lea.vmem %s308_s4, 256  ;;  %p460_p11 = scmp.lt.s32.totalorder %s308_s4, %s308_s4 }
  0x41   :  { %v153_v35 = vrot.slane %v148_v33, %v152_v32  ;;  %v157_v36 = vrot.slane %v148_v33, %v156_v34  ;;  %p456_p10 = scmp.ne.s32.totalorder %s308_s4, %s455_s9  ;;  %p461_p12 = scmp.lt.s32.totalorder %s455_s9, %s455_s9 }
  0x43   :  { %245 = vmatpush1.bf16.msra.mxu1 %v369_v10  ;;  %p462_p13 = por %p461_p12, %p460_p11 }
  0x44   :  { %246 = vmatprep.subr.bf16.mxu1 %v370_v11 }
  0x45   :  { %p463_p0 = pnand %p462_p13, %p456_p10 }
  0x47   :  { %247 = vmatpush1.bf16.msra.mxu1 %v372_v12 }
  0x48   :  { %248 = vmatprep.subr.bf16.mxu1 %v373_v13 }
  0x4b   :  { %249 = vmatpush1.bf16.msra.mxu1 %v375_v14 }
  0x4c   :  { %250 = vmatprep.subr.bf16.mxu1 %v376_v15 }
  0x4f   :  { %251 = vmatpush1.bf16.msra.mxu1 %v378_v16 }
  0x50   :  { %252 = vmatprep.subr.bf16.mxu1 %v379_v17 }
  0x53   :  { %253 = vmatpush1.bf16.msra.mxu1 %v381_v18 }
  0x54   :  { %254 = vmatprep.subr.bf16.mxu1 %v382_v19 }
  0x57   :  { %255 = vmatpush1.bf16.msra.mxu1 %v384_v20 }
 0x113   :  { %v124_v23 = vpop.f32.mrb[0].mxu0 }
 0x114   :  { %v125_v24 = vadd.f32 %v317_v22, %v124_v23  ;;  %v346_v25 = vpop.f32.mrb[1].mxu0 }
 0x115   :  { %v127_v26 = vpop.f32.mrb[2].mxu0 }
 0x116   :  { %v130_v27 = vmax.f32 %v125_v24, 0.0  ;;  %v347_v28 = vpop.f32.mrb[3].mxu0 }
 0x118   :  { %v131_v29 = vpack.c.bf16 %v130_v27, %v130_v27 }
 0x11a   :  { %273 = vmatmul.mubr.bf16.vlgmr.msra.gmra.mrb[0].mxu1 %v131_v29 }
 0x1ed   :  { %v274_v37 = vpop.f32.mrb[0].mxu1 }
 0x1ee   :  { %v275_v38 = vadd.f32 %v274_v37, %v153_v35  ;;  %v276_v39 = vpop.f32.mrb[1].mxu1 }
 0x1ef   :  { %v277_v40 = vadd.f32 %v276_v39, %v157_v36  ;;  %v278_v41 = vpop.f32.mrb[2].mxu1 }
 0x1f0   :  { %v284_v42 = vand.u32 2147483647, %v275_v38  ;;  %v279_v43 = vpop.f32.mrb[3].mxu1  ;;  %v281_v54 = vmax.f32 %v275_v38, 0.0  ;;  %vm282_vm3 = vcmp.ne.f32.partialorder %v275_v38, %v275_v38 }
 0x1f1   :  { %300 = vst [vmem:[#allocation8 + $0x8] sm:$0xff] %v277_v40 }
 0x1f2   :  { %v285_v44 = vsub.f32 0.0, %v284_v42 }
 0x1f4   :  { %v286_v45 = vmul.f32 1.442695, %v285_v44 }
 0x1f6   :  { %385 = vpow2.f32 %v286_v45 }
 0x200   :  { %v386_v46 = vpop.eup %385 }
 0x201   :  { %v288_v47 = vadd.f32 1.0, %v386_v46  ;;  %v291_v48 = vmul.f32 -0.5, %v386_v46  ;;  %v294_v50 = vand.u32 2147483647, %v386_v46 }
 0x203   :  { %387 = vlog2.f32 %v288_v47  ;;  %v292_v49 = vadd.f32 1.0, %v291_v48  ;;  %vm295_vm2 = vcmp.lt.f32.partialorder %v294_v50, 0.0004427343 }
 0x205   :  { %v293_v53 = vmul.f32 %v386_v46, %v292_v49 }
 0x20d   :  { %v388_v51 = vpop.eup %387 }
 0x20e   :  { %v290_v52 = vmul.f32 0.6931472, %v388_v51 }
 0x210   :  { %v296_v55 = vsel %vm295_vm2, %v293_v53, %v290_v52 }
 0x211   :  { %v297_v56 = vadd.f32 %v296_v55, %v281_v54 }
 0x213   :  { %v298_v57 = vsel %vm282_vm3, %v275_v38, %v297_v56 }
 0x214   :  { %299 = vst [vmem:[#allocation8] sm:$0xff] %v298_v57 }
 0x215   :  { %466 = shalt.err (!%p463_p0)
}
 0x216   :  { %s467_s12 = scalar_lea.hbm %s583_s5, 256 }
 0x217   :  { %p468_p1 = scmp.ne.s32.totalorder %s583_s5, %s467_s12  ;;  %p471_p2 = scmp.lt.u32.totalorder %s467_s12, %s583_s5 }
 0x219   :  { %p473_p3 = pnand %p471_p2, %p468_p1 }
 0x21b   :  { %476 = shalt.err (!%p473_p3)
}
 0x21c   :  { %310 = dma.vmem_to_hbm [thread:$0]  %s308_s4, 256, %s583_s5, [#allocation4]  }
 0x21d   :  { %481 = dma.done.wait [#allocation4], 256  }
 0x21e   :  { %482 = vsyncadd [#allocation4], 4294967040 }
 0x21f   :  { %314 = vsyncpa [#allocation3], 1 }
 0x220   :  { %315 = vsyncpa [#allocation6], 1 }
 0x221   :  { %316 = vsyncpa [#allocation4], 1 }

</bundles_post_ra>
